<compile_context>
chip_gen: v7x
topology: tpu7x:2x2x1
jax: 0.10.0
libtpu: 0.0.40
codegen_flags: <defaults>
</compile_context>

<pallas_src>
import jax
import jax.numpy as jnp
from jax.experimental import pallas as pl
from jax.experimental.pallas import tpu as pltpu


_LANE = 128
_SUBLANE = 8


def _vmem_capacity_bytes():
    try:
        return int(pltpu.get_tpu_info().vmem_capacity_bytes)
    except Exception:
        return 64 * 1024 * 1024  # conservative default (v7x floor)


_VMEM_CAP = _vmem_capacity_bytes()
# Explicit scoped-VMEM budget for every pallas_call (raise over the 16/32 MiB
# scoped defaults, stay well under physical VMEM of every generation).
_VMEM_LIMIT = min(_VMEM_CAP // 2, 64 * 1024 * 1024)
# Per-block byte budget: in+out blocks double-buffered => ~4x this, i.e.
# <= _VMEM_LIMIT / 2, leaving 2x headroom.  v5e/v6e: 8 MiB, v7x: 4 MiB.
_TILE_BUDGET = max(1 << 20, _VMEM_LIMIT // 8)


# ---------------------------------------------------------------------------
# Small helpers
# ---------------------------------------------------------------------------
def _minor_tile(dim, row_bytes, budget, align):
    """Tile for a minor dim: full extent if it fits the budget, else the
    largest `align`-multiple that does (ragged tail handled by cdiv grid)."""
    if dim * row_bytes <= budget:
        return dim
    t = max(align, (budget // max(1, row_bytes)) // align * align)
    return min(t, pl.cdiv(dim, align) * align)


def _largest_divisor_leq(n, cap):
    cap = max(1, min(n, cap))
    for t in range(cap, 0, -1):
        if n % t == 0:
            return t
    return 1


def _make_swap_kernel(ax0, ax1):
    def kernel(x_ref, o_ref):
        o_ref[...] = jnp.swapaxes(x_ref[...], ax0, ax1)
    return kernel


def _make_index_map(assign):
    # assign[d] is either None (block coord 0: folded / full-extent dim) or an
    # int grid-axis index whose grid coordinate is this dim's block coord.
    def index_map(*g):
        return tuple(0 if a is None else g[a] for a in assign)
    return index_map


def _pallas_transpose_call(x, out_sds, kernel, grid, in_block, in_assign,
                           out_block, out_assign, bytes_accessed):
    return pl.pallas_call(
        kernel,
        out_shape=out_sds,
        grid=tuple(grid),
        in_specs=[pl.BlockSpec(tuple(in_block), _make_index_map(tuple(in_assign)))],
        out_specs=pl.BlockSpec(tuple(out_block), _make_index_map(tuple(out_assign))),
        compiler_params=pltpu.CompilerParams(
            # TODO(synk): pltpu.CORE_PARALLEL on the outermost axis would shard
            # this mem-bound copy across v7x's 2 TensorCores; plain "parallel"
            # kept as the portable / safe choice.
            dimension_semantics=("parallel",) * len(grid),
            vmem_limit_bytes=_VMEM_LIMIT),
        cost_estimate=pl.CostEstimate(
            flops=0, transcendentals=0, bytes_accessed=bytes_accessed),
    )(x)


# ---------------------------------------------------------------------------
# Case A: swap of the two minor (sublane <-> lane) dims
# ---------------------------------------------------------------------------
def _transpose_minor(x, out_sds, itemsize, bytes_accessed):
    ndim = x.ndim
    n_lead = ndim - 2
    S, D = x.shape[-2], x.shape[-1]

    # 128-aligned partial tiles (cdiv grids, masked tails) or full extents,
    # shrunk jointly to the per-block budget.
    cap = 1024
    TS = S if S <= cap else cap
    TD = D if D <= cap else cap
    while TS * TD * itemsize > _TILE_BUDGET:
        if TD >= TS and TD > _LANE:
            TD = max(_LANE, (TD // 2) // _LANE * _LANE)
        elif TS > _LANE:
            TS = max(_LANE, (TS // 2) // _LANE * _LANE)
        else:
            break

    # Fold leading batch dims into the block (bigger DMAs, fewer grid steps),
    # innermost first, under the same budget.
    lead_ext = [1] * n_lead
    blk_bytes = TS * TD * itemsize
    for d in range(n_lead - 1, -1, -1):
        nb = blk_bytes * x.shape[d]
        if nb > _TILE_BUDGET:
            break
        lead_ext[d] = x.shape[d]
        blk_bytes = nb

    grid_lead = [d for d in range(n_lead) if lead_ext[d] == 1 and x.shape[d] > 1]
    pos = {d: i for i, d in enumerate(grid_lead)}
    n_g = len(grid_lead)
    d_axis, s_axis = n_g, n_g + 1  # S-block axis innermost: lane-contiguous writes
    grid = [x.shape[d] for d in grid_lead] + [pl.cdiv(D, TD), pl.cdiv(S, TS)]

    in_assign = [pos.get(d) for d in range(n_lead)] + [s_axis, d_axis]
    out_assign = [pos.get(d) for d in range(n_lead)] + [d_axis, s_axis]
    in_block = lead_ext + [TS, TD]
    out_block = lead_ext + [TD, TS]

    return _pallas_transpose_call(
        x, out_sds, _make_swap_kernel(-2, -1), grid,
        in_block, in_assign, out_block, out_assign, bytes_accessed)


# ---------------------------------------------------------------------------
# Case B: swap of two leading (batch-like) dims
# ---------------------------------------------------------------------------
def _transpose_leading(x, out_sds, lo, hi, itemsize, bytes_accessed):
    ndim = x.ndim
    S, D = x.shape[-2], x.shape[-1]

    # Minor plane is untouched by the swap: take it whole when it fits, else
    # 128/8-aligned tiles.
    TD = _minor_tile(D, _SUBLANE * itemsize, _TILE_BUDGET, _LANE)
    TS = _minor_tile(S, TD * itemsize, _TILE_BUDGET, _SUBLANE)
    blk_bytes = TS * TD * itemsize

    ext = [1] * (ndim - 2) + [TS, TD]

    # Fold every non-swapped leading dim we can afford, innermost first.
    for d in range(ndim - 3, -1, -1):
        if d in (lo, hi):
            continue
        nb = blk_bytes * x.shape[d]
        if nb > _TILE_BUDGET:
            break
        ext[d] = x.shape[d]
        blk_bytes = nb

    # Tile the swapped dims themselves (the in-kernel sublane-level swap
    # collapses t_lo*t_hi grid steps into a single block).
    t_hi = _largest_divisor_leq(x.shape[hi], max(1, _TILE_BUDGET // blk_bytes))
    blk_bytes *= t_hi
    t_lo = _largest_divisor_leq(x.shape[lo], max(1, _TILE_BUDGET // blk_bytes))
    blk_bytes *= t_lo
    ext[lo], ext[hi] = t_lo, t_hi

    grid_lead = [d for d in range(ndim - 2)
                 if d not in (lo, hi) and ext[d] == 1 and x.shape[d] > 1]
    pos = {d: i for i, d in enumerate(grid_lead)}

    grid = [x.shape[d] for d in grid_lead]
    j_axis = len(grid); grid.append(pl.cdiv(x.shape[hi], t_hi))
    i_axis = len(grid); grid.append(pl.cdiv(x.shape[lo], t_lo))
    s_axis = None
    if TS < S:
        s_axis = len(grid); grid.append(pl.cdiv(S, TS))
    d_axis = None
    if TD < D:
        d_axis = len(grid); grid.append(pl.cdiv(D, TD))  # innermost: lane-contig

    in_assign = [pos.get(d) for d in range(ndim - 2)] + [s_axis, d_axis]
    in_assign[lo] = i_axis
    in_assign[hi] = j_axis
    out_assign = list(in_assign)
    out_assign[lo], out_assign[hi] = j_axis, i_axis

    in_block = list(ext)
    out_block = list(ext)
    out_block[lo], out_block[hi] = ext[hi], ext[lo]

    return _pallas_transpose_call(
        x, out_sds, _make_swap_kernel(lo, hi), grid,
        in_block, in_assign, out_block, out_assign, bytes_accessed)


# ---------------------------------------------------------------------------
# Case C: swap of a leading dim with the sublane dim (e.g. attention's
# (B, N, H, dh).transpose(1, 2)).  Sublane-only reshuffle, no lane crossing.
# ---------------------------------------------------------------------------
def _transpose_lead_sublane(x, out_sds, lo, itemsize, bytes_accessed):
    ndim = x.ndim
    S, D = x.shape[-2], x.shape[-1]   # S = input sublane dim (goes to pos `lo`)
    A = x.shape[lo]                   # goes to the output sublane position

    TD = _minor_tile(D, _SUBLANE * itemsize, _TILE_BUDGET, _LANE)
    row = TD * itemsize
    # t_A becomes the OUTPUT sublane extent -> multiple of 8 (or full A).
    if A * row <= _TILE_BUDGET:
        t_A = A
    else:
        t_A = max(_SUBLANE, (_TILE_BUDGET // row) // _SUBLANE * _SUBLANE)
    # t_S is the INPUT sublane extent -> multiple of 8 (or full S).
    rowA = t_A * row
    if S * rowA <= _TILE_BUDGET:
        t_S = S
    else:
        t_S = max(_SUBLANE, (_TILE_BUDGET // rowA) // _SUBLANE * _SUBLANE)
    blk_bytes = t_A * t_S * TD * itemsize

    ext = [1] * (ndim - 2) + [t_S, TD]
    ext[lo] = t_A

    # Fold remaining (non-swapped) leading dims, innermost first.
    for d in range(ndim - 3, -1, -1):
        if d == lo:
            continue
        nb = blk_bytes * x.shape[d]
        if nb > _TILE_BUDGET:
            break
        ext[d] = x.shape[d]
        blk_bytes = nb

    grid_lead = [d for d in range(ndim - 2)
                 if d != lo and ext[d] == 1 and x.shape[d] > 1]
    pos = {d: i for i, d in enumerate(grid_lead)}

    grid = [x.shape[d] for d in grid_lead]
    j_axis = len(grid); grid.append(pl.cdiv(S, t_S))   # blocks along input sublane
    i_axis = len(grid); grid.append(pl.cdiv(A, t_A))   # blocks along dim `lo`
    d_axis = None
    if TD < D:
        d_axis = len(grid); grid.append(pl.cdiv(D, TD))  # innermost: lane-contig

    in_assign = [pos.get(d) for d in range(ndim - 2)] + [j_axis, d_axis]
    in_assign[lo] = i_axis
    out_assign = list(in_assign)
    out_assign[lo] = j_axis
    out_assign[ndim - 2] = i_axis

    in_block = list(ext)
    out_block = list(ext)
    out_block[lo] = t_S
    out_block[ndim - 2] = t_A

    return _pallas_transpose_call(
        x, out_sds, _make_swap_kernel(lo, ndim - 2), grid,
        in_block, in_assign, out_block, out_assign, bytes_accessed)


# ---------------------------------------------------------------------------
# Dispatcher + module
# ---------------------------------------------------------------------------
def transpose_pallas(x, dim0, dim1):
    ndim = x.ndim
    dim0 %= ndim
    dim1 %= ndim
    if dim0 == dim1:
        return x

    lo, hi = sorted((dim0, dim1))
    out_shape = list(x.shape)
    out_shape[dim0], out_shape[dim1] = out_shape[dim1], out_shape[dim0]
    out_sds = jax.ShapeDtypeStruct(tuple(out_shape), x.dtype)

    if x.size == 0:
        return jnp.swapaxes(x, dim0, dim1)

    itemsize = jnp.dtype(x.dtype).itemsize
    bytes_accessed = 2 * x.size * itemsize

    if lo == ndim - 2 and hi == ndim - 1:
        return _transpose_minor(x, out_sds, itemsize, bytes_accessed)
    if hi < ndim - 2:
        return _transpose_leading(x, out_sds, lo, hi, itemsize, bytes_accessed)
    if hi == ndim - 2:
        return _transpose_lead_sublane(x, out_sds, lo, itemsize, bytes_accessed)
    # TODO(synk): leading <-> lane-dim swap (lo < ndim-2, hi == ndim-1) needs a
    # lane-crossing relayout; left to XLA's transpose.
    return jnp.swapaxes(x, dim0, dim1)


class Transpose:
    """JAX/Pallas equivalent of the PyTorch Transpose(dim0, dim1) module."""

    def __init__(self, dim0, dim1):
        self.dim0 = dim0
        self.dim1 = dim1

    def __call__(self, x):
        return transpose_pallas(x, self.dim0, self.dim1)


if __name__ == "__main__":
    key = jax.random.PRNGKey(0)
    k0, k1, k2, k3, k4 = jax.random.split(key, 5)

    # 1) ViT-style usage: (B, N, D) tokens, transpose(1, 2) -> (B, D, N). Case A.
    x = jax.random.normal(k0, (2, 8, 128), dtype=jnp.float32)
    y = jax.block_until_ready(Transpose(1, 2)(x))
    assert y.shape == (2, 128, 8), y.shape
    assert jnp.array_equal(y, jnp.swapaxes(x, 1, 2))

    # 2) Minor swap on a square-ish plane (Case A, single folded block).
    x1 = jax.random.normal(k1, (1, 256, 256), dtype=jnp.float32)
    y1 = jax.block_until_ready(Transpose(-2, -1)(x1))
    assert y1.shape == (1, 256, 256), y1.shape
    assert jnp.array_equal(y1, jnp.swapaxes(x1, -2, -1))

    # 3) Leading-dim swap: (B, C, H, W) transpose(0, 1) -> (C, B, H, W). Case B.
    x2 = jax.random.normal(k2, (2, 4, 8, 128), dtype=jnp.float32)
    y2 = jax.block_until_ready(Transpose(0, 1)(x2))
    assert y2.shape == (4, 2, 8, 128), y2.shape
    assert jnp.array_equal(y2, jnp.swapaxes(x2, 0, 1))

    # 4) 5-D leading-dim swap: folding of the middle dim + tiled swapped dims.
    x3 = jax.random.normal(k3, (4, 4, 3, 8, 128), dtype=jnp.float32)
    y3 = jax.block_until_ready(Transpose(0, 1)(x3))
    assert y3.shape == (4, 4, 3, 8, 128), y3.shape
    assert jnp.array_equal(y3, jnp.swapaxes(x3, 0, 1))

    # 5) Attention-style mixed swap: (B, N, H, dh).transpose(1, 2). Case C.
    x4 = jax.random.normal(k4, (2, 16, 4, 32), dtype=jnp.float32)
    y4 = jax.block_until_ready(Transpose(1, 2)(x4))
    assert y4.shape == (2, 4, 16, 32), y4.shape
    assert jnp.array_equal(y4, jnp.swapaxes(x4, 1, 2))

    # 6) Leading <-> lane-dim swap -> documented XLA fallback.
    y5 = jax.block_until_ready(Transpose(1, 3)(x2))
    assert jnp.array_equal(y5, jnp.swapaxes(x2, 1, 3))

    print("KERNEL_OK")
</pallas_src>

<mosaic_0001>
module attributes {stable_mosaic.version = 11 : i64} {
  func.func @kernel(%arg0: i32, %arg1: i32, %arg2: memref<2x8x128xf32, #tpu.memory_space<vmem>>, %arg3: memref<2x128x8xf32, #tpu.memory_space<vmem>>) attributes {dimension_semantics = [#tpu.dimension_semantics<parallel>, #tpu.dimension_semantics<parallel>], iteration_bounds = array<i64: 1, 1>, scalar_prefetch = 0 : i64, scratch_operands = 0 : i64, tpu.core_type = #tpu.core_type<tc>, window_params = [{transform_indices = @transform_0, window_bounds = array<i64: 2, 8, 128>}, {transform_indices = @transform_1, window_bounds = array<i64: 2, 128, 8>}]} {
    %c0 = arith.constant 0 : index
    %c0_0 = arith.constant 0 : index
    %c0_1 = arith.constant 0 : index
    %0 = vector.load %arg2[%c0, %c0_0, %c0_1] : memref<2x8x128xf32, #tpu.memory_space<vmem>>, vector<2x8x128xf32>
    %1 = tpu.transpose %0, [0, 2, 1] : vector<2x8x128xf32> -> vector<2x128x8xf32>
    %c0_2 = arith.constant 0 : index
    %c0_3 = arith.constant 0 : index
    %c0_4 = arith.constant 0 : index
    %2 = vector.load %arg3[%c0_2, %c0_3, %c0_4] : memref<2x128x8xf32, #tpu.memory_space<vmem>>, vector<2x128x8xf32>
    tpu.vector_store %arg3[%c0_2, %c0_3, %c0_4], %1 {strides = array<i32>} : memref<2x128x8xf32, #tpu.memory_space<vmem>>, vector<2x128x8xf32>,
    return
  }
  func.func @transform_0(%arg0: i32, %arg1: i32) -> (i32, i32, i32) {
    %c0_i32 = arith.constant 0 : i32
    %c0_i32_0 = arith.constant 0 : i32
    return %c0_i32, %arg1, %arg0 : i32, i32, i32
  }
  func.func @transform_1(%arg0: i32, %arg1: i32) -> (i32, i32, i32) {
    %c0_i32 = arith.constant 0 : i32
    %c0_i32_0 = arith.constant 0 : i32
    return %c0_i32, %arg0, %arg1 : i32, i32, i32
  }
}

</mosaic_0001>

<bundles_post_ra>
// kernel: tpu_custom_call.1
= control target key start
LH: loop header
LB: loop body
LE: loop exit
PB: predicated region body
PF: predicated region fallthrough
CT: control target
= control target key end

     0   :  { %6 = vsyncpa [#allocation3], 0  ;;  %s154_s6 = smov [#allocation2]   ;;  %s307_s0 = inlined_call_operand.hbm [shape: f32[2,8,128], index: 0, kind: input, shape index: {}]   ;;  %s308_s1 = inlined_call_operand.vmem [shape: f32[2,128,8], index: 1, kind: output, shape index: {}]  }
   0x1   :  { %s12_s7 = sshll.u32 %s154_s6, 4  ;;  %s130_s10 = scalar_lea.hbm %s307_s0, 256  ;;  %s13_s7 = int_to_ptr.vmem [resolvable:$true] %s12_s7 }
   0x2   :  { %p131_p0 = scmp.ne.s32.totalorder %s307_s0, %s130_s10  ;;  %p134_p1 = scmp.lt.u32.totalorder %s130_s10, %s307_s0 }
   0x4   :  { %p136_p2 = pnand %p134_p1, %p131_p0 }
   0x6   :  { %139 = shalt.err (!%p136_p2)
}
   0x7   :  { %s140_s15 = scalar_lea.vmem %s13_s7, 256  ;;  %p145_p4 = scmp.lt.s32.totalorder %s13_s7, %s13_s7 }
   0x8   :  { %p141_p3 = scmp.ne.s32.totalorder %s13_s7, %s140_s15  ;;  %p146_p5 = scmp.lt.s32.totalorder %s140_s15, %s140_s15 }
   0xa   :  { %p147_p6 = por %p146_p5, %p145_p4 }
   0xc   :  { %p148_p7 = pnand %p147_p6, %p141_p3 }
   0xe   :  { %151 = shalt.err (!%p148_p7)
}
   0xf   :  { %s155_s16 = smov 128   ;;  %s156_s17 = smov 8  }
  0x10   :  { %18 = dma.hbm_to_vmem [thread:$0]  %s307_s0, 256, %s13_s7, [#allocation3], %s155_s16, %s155_s16, %s156_s17  }
  0x11   :  { %152 = dma.done.wait [#allocation3], 256  }
  0x12   :  { %153 = vsyncadd [#allocation3], 4294967040  ;;  %v22_v0 = vld [vmem:[#allocation2] sm:$0xff]  ;;  %v23_v1 = vld [vmem:[#allocation2 + $0x8] sm:$0xff]  ;;  %vm88_vm0 = vcmask 64512  }
  0x13   :  { %24 = vxpose.xlu0.b32.start.end [1/1] (short) %v22_v0, 128 }
  0x50   :  { %56 = vxpose.xlu0.b32.start.end [1/1] (short) %v23_v1, 128 }
  0x93   :  { %v40_v2 = vpop.trf.xlu0 }
  0x94   :  { %89 = vst.msk [vmem:[%s308_s1] sm:$0xff] %vm88_vm0, %v40_v2 }
  0x97   :  { %v41_v3 = vpop.trf.xlu0 }
  0x98   :  { %90 = vst.msk [vmem:[%s308_s1 + $0x8] sm:$0xff] %vm88_vm0, %v41_v3 }
  0x9b   :  { %v42_v4 = vpop.trf.xlu0 }
  0x9c   :  { %91 = vst.msk [vmem:[%s308_s1 + $0x10] sm:$0xff] %vm88_vm0, %v42_v4 }
  0x9f   :  { %v43_v5 = vpop.trf.xlu0 }
  0xa0   :  { %92 = vst.msk [vmem:[%s308_s1 + $0x18] sm:$0xff] %vm88_vm0, %v43_v5 }
  0xa3   :  { %v44_v6 = vpop.trf.xlu0 }
  0xa4   :  { %93 = vst.msk [vmem:[%s308_s1 + $0x20] sm:$0xff] %vm88_vm0, %v44_v6 }
  0xa7   :  { %v45_v7 = vpop.trf.xlu0 }
  0xa8   :  { %94 = vst.msk [vmem:[%s308_s1 + $0x28] sm:$0xff] %vm88_vm0, %v45_v7 }
  0xab   :  { %v46_v8 = vpop.trf.xlu0 }
  0xac   :  { %95 = vst.msk [vmem:[%s308_s1 + $0x30] sm:$0xff] %vm88_vm0, %v46_v8 }
  0xaf   :  { %v47_v9 = vpop.trf.xlu0 }
  0xb0   :  { %96 = vst.msk [vmem:[%s308_s1 + $0x38] sm:$0xff] %vm88_vm0, %v47_v9 }
  0xb3   :  { %v48_v10 = vpop.trf.xlu0 }
  0xb4   :  { %97 = vst.msk [vmem:[%s308_s1 + $0x40] sm:$0xff] %vm88_vm0, %v48_v10 }
  0xb7   :  { %v49_v11 = vpop.trf.xlu0 }
  0xb8   :  { %98 = vst.msk [vmem:[%s308_s1 + $0x48] sm:$0xff] %vm88_vm0, %v49_v11 }
  0xbb   :  { %v50_v12 = vpop.trf.xlu0 }
  0xbc   :  { %99 = vst.msk [vmem:[%s308_s1 + $0x50] sm:$0xff] %vm88_vm0, %v50_v12 }
  0xbf   :  { %v51_v13 = vpop.trf.xlu0 }
  0xc0   :  { %100 = vst.msk [vmem:[%s308_s1 + $0x58] sm:$0xff] %vm88_vm0, %v51_v13 }
  0xc3   :  { %v52_v14 = vpop.trf.xlu0 }
  0xc4   :  { %101 = vst.msk [vmem:[%s308_s1 + $0x60] sm:$0xff] %vm88_vm0, %v52_v14 }
  0xc7   :  { %v53_v15 = vpop.trf.xlu0 }
  0xc8   :  { %102 = vst.msk [vmem:[%s308_s1 + $0x68] sm:$0xff] %vm88_vm0, %v53_v15 }
  0xcb   :  { %v54_v16 = vpop.trf.xlu0 }
  0xcc   :  { %103 = vst.msk [vmem:[%s308_s1 + $0x70] sm:$0xff] %vm88_vm0, %v54_v16 }
  0xcf   :  { %v55_v17 = vpop.trf.xlu0 }
  0xd0   :  { %104 = vst.msk [vmem:[%s308_s1 + $0x78] sm:$0xff] %vm88_vm0, %v55_v17 }
  0xd3   :  { %v72_v18 = vpop.trf.xlu0 }
  0xd4   :  { %105 = vst.msk [vmem:[%s308_s1 + $0x80] sm:$0xff] %vm88_vm0, %v72_v18 }
  0xd7   :  { %v73_v19 = vpop.trf.xlu0 }
  0xd8   :  { %106 = vst.msk [vmem:[%s308_s1 + $0x88] sm:$0xff] %vm88_vm0, %v73_v19 }
  0xdb   :  { %v74_v20 = vpop.trf.xlu0 }
  0xdc   :  { %107 = vst.msk [vmem:[%s308_s1 + $0x90] sm:$0xff] %vm88_vm0, %v74_v20 }
  0xdf   :  { %v75_v21 = vpop.trf.xlu0 }
  0xe0   :  { %108 = vst.msk [vmem:[%s308_s1 + $0x98] sm:$0xff] %vm88_vm0, %v75_v21 }
  0xe3   :  { %v76_v22 = vpop.trf.xlu0 }
  0xe4   :  { %109 = vst.msk [vmem:[%s308_s1 + $0xa0] sm:$0xff] %vm88_vm0, %v76_v22 }
  0xe7   :  { %v77_v23 = vpop.trf.xlu0 }
  0xe8   :  { %110 = vst.msk [vmem:[%s308_s1 + $0xa8] sm:$0xff] %vm88_vm0, %v77_v23 }
  0xeb   :  { %v78_v24 = vpop.trf.xlu0 }
  0xec   :  { %111 = vst.msk [vmem:[%s308_s1 + $0xb0] sm:$0xff] %vm88_vm0, %v78_v24 }
  0xef   :  { %v79_v25 = vpop.trf.xlu0 }
  0xf0   :  { %112 = vst.msk [vmem:[%s308_s1 + $0xb8] sm:$0xff] %vm88_vm0, %v79_v25 }
  0xf3   :  { %v80_v26 = vpop.trf.xlu0 }
  0xf4   :  { %113 = vst.msk [vmem:[%s308_s1 + $0xc0] sm:$0xff] %vm88_vm0, %v80_v26 }
  0xf7   :  { %v81_v27 = vpop.trf.xlu0 }
  0xf8   :  { %114 = vst.msk [vmem:[%s308_s1 + $0xc8] sm:$0xff] %vm88_vm0, %v81_v27 }
  0xfb   :  { %v82_v28 = vpop.trf.xlu0 }
  0xfc   :  { %115 = vst.msk [vmem:[%s308_s1 + $0xd0] sm:$0xff] %vm88_vm0, %v82_v28 }
  0xff   :  { %v83_v29 = vpop.trf.xlu0 }
 0x100   :  { %116 = vst.msk [vmem:[%s308_s1 + $0xd8] sm:$0xff] %vm88_vm0, %v83_v29 }
 0x103   :  { %v84_v30 = vpop.trf.xlu0 }
 0x104   :  { %117 = vst.msk [vmem:[%s308_s1 + $0xe0] sm:$0xff] %vm88_vm0, %v84_v30 }
 0x107   :  { %v85_v31 = vpop.trf.xlu0 }
 0x108   :  { %118 = vst.msk [vmem:[%s308_s1 + $0xe8] sm:$0xff] %vm88_vm0, %v85_v31 }
 0x10b   :  { %v86_v32 = vpop.trf.xlu0 }
 0x10c   :  { %119 = vst.msk [vmem:[%s308_s1 + $0xf0] sm:$0xff] %vm88_vm0, %v86_v32 }
 0x10f   :  { %v87_v33 = vpop.trf.xlu0 }
 0x110   :  { %120 = vst.msk [vmem:[%s308_s1 + $0xf8] sm:$0xff] %vm88_vm0, %v87_v33 }
 0x111   :  { %125 = vsyncpa [#allocation3], 1 }

</bundles_post_ra>
